<compile_context>
chip_gen: v7x
topology: tpu7x:2x2x1
jax: 0.10.0
libtpu: 0.0.40
codegen_flags: <defaults>
</compile_context>

<pallas_src>
import jax
import jax.numpy as jnp
from jax.experimental import pallas as pl
from jax.experimental.pallas import tpu as pltpu

EPS = 1e-5  # PyTorch nn.LayerNorm default


def _round_up(n, m):
    return ((n + m - 1) // m) * m


def layernorm_linear_kernel(x_ref, w_ref, b_ref, o_ref):
    # x_ref: (TILE_N, D) token rows
    # w_ref: (D, TILE_DOUT)  folded weight column tile (gamma already folded in)
    # b_ref: (1, TILE_DOUT)  folded bias column tile   (beta already folded in)
    # o_ref: (TILE_N, TILE_DOUT)
    x = x_ref[...].astype(jnp.float32)
    inv_d = 1.0 / x.shape[-1]

    # One-pass LayerNorm statistics: two lane (XLU) reductions total.
    s1 = jnp.sum(x, axis=-1, keepdims=True)
    s2 = jnp.sum(x * x, axis=-1, keepdims=True)
    mean = s1 * inv_d
    # Clamp: E[x^2] - mean^2 can go slightly negative from cancellation.
    var = jnp.maximum(s2 * inv_d - mean * mean, 0.0)
    inv = jax.lax.rsqrt(var + EPS)

    xhat = ((x - mean) * inv).astype(w_ref.dtype)

    # fn = Linear: xhat @ W' + b' on the MXU, f32 accumulation.
    out = jnp.dot(xhat, w_ref[...], preferred_element_type=jnp.float32)
    out = out + b_ref[...].astype(jnp.float32)
    o_ref[...] = out.astype(o_ref.dtype)


def layer_normalize(x, gamma, beta, w, b, *, tile_n=512, mxu_dtype=None):
    """x: [B, S, D] -> fn(LayerNorm(x)) with fn = Linear(D, D).

    mxu_dtype: optional (e.g. jnp.bfloat16) cast of the matmul operands for
    v6e/v7x MXU peak; LayerNorm statistics always stay in f32.
    """
    B, S, D = x.shape
    N = B * S

    # ---- fold the LN affine into the Linear (f32, before any bf16 cast) ----
    # fn(LN(x)) = ((x-mean)*inv*gamma + beta) @ W^T + b
    #           = xhat @ (gamma[:,None] * W^T) + (beta @ W^T + b)
    w_t = w.astype(jnp.float32).T                       # (in, out)
    w_fold = gamma.astype(jnp.float32)[:, None] * w_t   # (D, D)
    b_fold = beta.astype(jnp.float32) @ w_t + b.astype(jnp.float32)
    if mxu_dtype is not None:
        w_fold = w_fold.astype(mxu_dtype)
    b_fold = b_fold.reshape(1, D)

    # ---- row tiling (no wrapper pad; ragged last block handled by Pallas) --
    if N <= tile_n:
        tile_n = N                       # single full-height block (always legal)
    elif tile_n >= 256:
        tile_n = (tile_n // 256) * 256   # clean MXU M tiling on v6e/v7x
    else:
        tile_n = max(16, (tile_n // 16) * 16)
    n_row_blocks = pl.cdiv(N, tile_n)

    # ---- output-column layout ----------------------------------------------
    # Lane-dense (multiple-of-128) output columns only when D is large enough
    # that unmasked stores beat the extra HBM traffic of padded columns.
    if D <= 128 or D % 128 == 0:
        d_out = D
    else:
        d_out = _round_up(D, 128)
    if d_out != D:
        w_fold = jnp.pad(w_fold, ((0, 0), (0, d_out - D)))
        b_fold = jnp.pad(b_fold, ((0, 0), (0, d_out - D)))

    # Column-tile the weight when it is too big to sit resident in VMEM
    # (v7x: 64 MiB physical).  x's index_map is constant across the column
    # axis so the row block stays VMEM-resident while weight columns stream.
    w_itemsize = jnp.dtype(w_fold.dtype).itemsize
    max_cols = max(128, ((8 << 20) // (D * w_itemsize)) // 128 * 128)
    if d_out <= max_cols:
        tile_dout = d_out
    else:
        tile_dout = max_cols             # d_out is a multiple of 128 here
    n_col_blocks = pl.cdiv(d_out, tile_dout)

    grid = (n_row_blocks, n_col_blocks)

    itemsize = jnp.dtype(x.dtype).itemsize
    cost = pl.CostEstimate(
        flops=2 * N * D * d_out + 8 * N * D,
        transcendentals=N,
        bytes_accessed=(N * D + N * d_out) * itemsize
        + n_row_blocks * D * d_out * w_itemsize,
    )

    # Explicit VMEM budget: double-buffered x/out tiles + double-buffered
    # weight/bias column tiles + headroom, clamped to v7x's 64 MiB physical.
    vmem_needed = (2 * tile_n * D * itemsize
                   + 2 * tile_n * tile_dout * itemsize
                   + 2 * (D + 1) * tile_dout * w_itemsize)
    vmem_limit = int(min(max(1.5 * vmem_needed + (4 << 20), 32 << 20), 64 << 20))

    out = pl.pallas_call(
        layernorm_linear_kernel,
        out_shape=jax.ShapeDtypeStruct((N, d_out), x.dtype),
        grid_spec=pltpu.PrefetchScalarGridSpec(
            num_scalar_prefetch=0,
            grid=grid,
            in_specs=[
                pl.BlockSpec((tile_n, D), lambda i, j: (i, 0)),     # x rows
                pl.BlockSpec((D, tile_dout), lambda i, j: (0, j)),  # folded W
                pl.BlockSpec((1, tile_dout), lambda i, j: (0, j)),  # folded b
            ],
            out_specs=pl.BlockSpec((tile_n, tile_dout), lambda i, j: (i, j)),
        ),
        compiler_params=pltpu.CompilerParams(
            # Both axes write disjoint output blocks -> shard across TCs.
            dimension_semantics=("parallel", "parallel"),
            vmem_limit_bytes=vmem_limit,
        ),
        cost_estimate=cost,
    )(x.reshape(N, D), w_fold, b_fold)

    if d_out != D:
        out = out[:, :D]
    return out.reshape(B, S, D)


def reference(x, gamma, beta, w, b):
    mean = jnp.mean(x, axis=-1, keepdims=True)
    var = jnp.mean((x - mean) ** 2, axis=-1, keepdims=True)
    y = (x - mean) * jax.lax.rsqrt(var + EPS) * gamma + beta
    return y @ w.T + b


if __name__ == "__main__":
    B, S, D = 2, 8, 32
    key = jax.random.PRNGKey(0)
    kx, kg, kbeta, kw, kb = jax.random.split(key, 5)

    x = jax.random.normal(kx, (B, S, D), dtype=jnp.float32)

    # Non-trivial LayerNorm affine so the gamma/beta -> W'/b' fold is exercised
    # (nn.LayerNorm default init is ones/zeros; trained params are arbitrary).
    gamma = 1.0 + 0.1 * jax.random.normal(kg, (D,), dtype=jnp.float32)
    beta = 0.1 * jax.random.normal(kbeta, (D,), dtype=jnp.float32)

    # fn := Linear(D, D), deterministic synthetic init (uniform, like PyTorch).
    bound = 1.0 / jnp.sqrt(D)
    w = jax.random.uniform(kw, (D, D), minval=-bound, maxval=bound,
                           dtype=jnp.float32)
    b = jax.random.uniform(kb, (D,), minval=-bound, maxval=bound,
                           dtype=jnp.float32)

    # f32 matmul here so the tight tolerance holds; pass
    # mxu_dtype=jnp.bfloat16 on v6e/v7x bf16 models for MXU peak.
    out = layer_normalize(x, gamma, beta, w, b)
    out = jax.block_until_ready(out)

    ref = reference(x, gamma, beta, w, b)
    assert out.shape == (B, S, D)
    assert jnp.allclose(out, ref, atol=1e-4, rtol=1e-4), "mismatch vs reference"

    print("KERNEL_OK")
</pallas_src>

<mosaic_0001>
module attributes {stable_mosaic.version = 11 : i64} {
  func.func @layernorm_linear_kernel(%arg0: i32, %arg1: i32, %arg2: memref<16x32xf32, #tpu.memory_space<vmem>>, %arg3: memref<32x32xf32, #tpu.memory_space<vmem>>, %arg4: memref<1x32xf32, #tpu.memory_space<vmem>>, %arg5: memref<16x32xf32, #tpu.memory_space<vmem>>) attributes {dimension_semantics = [#tpu.dimension_semantics<parallel>, #tpu.dimension_semantics<parallel>], iteration_bounds = array<i64: 1, 1>, scalar_prefetch = 0 : i64, scratch_operands = 0 : i64, tpu.core_type = #tpu.core_type<tc>, window_params = [{transform_indices = @transform_0, window_bounds = array<i64: 16, 32>}, {transform_indices = @transform_1, window_bounds = array<i64: 32, 32>}, {transform_indices = @transform_2, window_bounds = array<i64: 1, 32>}, {transform_indices = @transform_3, window_bounds = array<i64: 16, 32>}]} {
    %c0 = arith.constant 0 : index
    %c0_0 = arith.constant 0 : index
    %0 = vector.load %arg2[%c0, %c0_0] : memref<16x32xf32, #tpu.memory_space<vmem>>, vector<16x32xf32>
    %cst = arith.constant dense<0.000000e+00> : vector<16xf32>
    %1 = vector.multi_reduction <add>, %0, %cst [1] : vector<16x32xf32> to vector<16xf32>
    %2 = vector.shape_cast %1 : vector<16xf32> to vector<16x1xf32>
    %3 = arith.mulf %0, %0 : vector<16x32xf32>
    %cst_1 = arith.constant dense<0.000000e+00> : vector<16xf32>
    %4 = vector.multi_reduction <add>, %3, %cst_1 [1] : vector<16x32xf32> to vector<16xf32>
    %5 = vector.shape_cast %4 : vector<16xf32> to vector<16x1xf32>
    %cst_2 = arith.constant 3.125000e-02 : f32
    %6 = vector.broadcast %cst_2 : f32 to vector<16x1xf32>
    %7 = arith.mulf %2, %6 : vector<16x1xf32>
    %cst_3 = arith.constant 3.125000e-02 : f32
    %8 = vector.broadcast %cst_3 : f32 to vector<16x1xf32>
    %9 = arith.mulf %5, %8 : vector<16x1xf32>
    %10 = arith.mulf %7, %7 : vector<16x1xf32>
    %11 = arith.subf %9, %10 : vector<16x1xf32>
    %cst_4 = arith.constant 0.000000e+00 : f32
    %12 = vector.broadcast %cst_4 : f32 to vector<16x1xf32>
    %13 = arith.maximumf %11, %12 : vector<16x1xf32>
    %cst_5 = arith.constant 9.99999974E-6 : f32
    %14 = vector.broadcast %cst_5 : f32 to vector<16x1xf32>
    %15 = arith.addf %13, %14 : vector<16x1xf32>
    %16 = math.rsqrt %15 : vector<16x1xf32>
    %17 = vector.broadcast %7 : vector<16x1xf32> to vector<16x32xf32>
    %18 = arith.subf %0, %17 : vector<16x32xf32>
    %19 = vector.broadcast %16 : vector<16x1xf32> to vector<16x32xf32>
    %20 = arith.mulf %18, %19 : vector<16x32xf32>
    %c0_6 = arith.constant 0 : index
    %c0_7 = arith.constant 0 : index
    %21 = vector.load %arg3[%c0_6, %c0_7] : memref<32x32xf32, #tpu.memory_space<vmem>>, vector<32x32xf32>
    %cst_8 = arith.constant dense<0.000000e+00> : vector<16x32xf32>
    %22 = tpu.matmul %20, %21, %cst_8 {dimension_numbers = #tpu.dot_dimension_numbers<[1], [0], [0], [1], [0, 0, 1, 1], [], []>} : vector<16x32xf32>, vector<32x32xf32>, vector<16x32xf32> -> vector<16x32xf32>
    %c0_9 = arith.constant 0 : index
    %c0_10 = arith.constant 0 : index
    %23 = vector.load %arg4[%c0_9, %c0_10] : memref<1x32xf32, #tpu.memory_space<vmem>>, vector<1x32xf32>
    %24 = vector.broadcast %23 : vector<1x32xf32> to vector<16x32xf32>
    %25 = arith.addf %22, %24 : vector<16x32xf32>
    %c0_11 = arith.constant 0 : index
    %c0_12 = arith.constant 0 : index
    %26 = vector.load %arg5[%c0_11, %c0_12] : memref<16x32xf32, #tpu.memory_space<vmem>>, vector<16x32xf32>
    tpu.vector_store %arg5[%c0_11, %c0_12], %25 {strides = array<i32>} : memref<16x32xf32, #tpu.memory_space<vmem>>, vector<16x32xf32>,
    return
  }
  func.func @transform_0(%arg0: i32, %arg1: i32) -> (i32, i32) {
    %c0_i32 = arith.constant 0 : i32
    %c0_i32_0 = arith.constant 0 : i32
    return %arg0, %c0_i32 : i32, i32
  }
  func.func @transform_1(%arg0: i32, %arg1: i32) -> (i32, i32) {
    %c0_i32 = arith.constant 0 : i32
    %c0_i32_0 = arith.constant 0 : i32
    return %c0_i32, %arg1 : i32, i32
  }
  func.func @transform_2(%arg0: i32, %arg1: i32) -> (i32, i32) {
    %c0_i32 = arith.constant 0 : i32
    %c0_i32_0 = arith.constant 0 : i32
    return %c0_i32, %arg1 : i32, i32
  }
  func.func @transform_3(%arg0: i32, %arg1: i32) -> (i32, i32) {
    %c0_i32 = arith.constant 0 : i32
    return %arg0, %arg1 : i32, i32
  }
}

</mosaic_0001>

<bundles_post_ra>
// kernel: tpu_custom_call.1
= control target key start
LH: loop header
LB: loop body
LE: loop exit
PB: predicated region body
PF: predicated region fallthrough
CT: control target
= control target key end

     0   :  { %8 = vsyncpa [#allocation3], 0  ;;  %s380_s0 = inlined_call_operand.hbm [shape: f32[16,32], index: 0, kind: input, shape index: {}]   ;;  %s381_s1 = inlined_call_operand.hbm [shape: f32[32,32], index: 1, kind: input, shape index: {}]   ;;  %s382_s2 = inlined_call_operand.vmem [shape: f32[1,32], index: 2, kind: input, shape index: {}]   ;;  %s383_s3 = inlined_call_operand.hbm [shape: f32[16,32], index: 3, kind: output, shape index: {}]  }
   0x1   :  { %9 = vsyncpa [#allocation6], 0 }
   0x2   :  { %10 = vsyncpa [#allocation4], 0  ;;  %s299_s12 = smov [#allocation2]   ;;  %s227_s16 = scalar_lea.hbm %s380_s0, 256 }
   0x3   :  { %s16_s13 = sshll.u32 %s299_s12, 4  ;;  %p228_p0 = scmp.ne.s32.totalorder %s380_s0, %s227_s16  ;;  %s17_s13 = int_to_ptr.vmem [resolvable:$true] %s16_s13 }
   0x4   :  { %p231_p1 = scmp.lt.u32.totalorder %s227_s16, %s380_s0 }
   0x6   :  { %p233_p2 = pnand %p231_p1, %p228_p0 }
   0x8   :  { %236 = shalt.err (!%p233_p2)
}
   0x9   :  { %s237_s21 = scalar_lea.vmem %s17_s13, 256  ;;  %p242_p4 = scmp.lt.s32.totalorder %s17_s13, %s17_s13 }
   0xa   :  { %p238_p3 = scmp.ne.s32.totalorder %s17_s13, %s237_s21  ;;  %p243_p5 = scmp.lt.s32.totalorder %s237_s21, %s237_s21 }
   0xc   :  { %p244_p6 = por %p243_p5, %p242_p4 }
   0xe   :  { %p245_p7 = pnand %p244_p6, %p238_p3 }
  0x10   :  { %248 = shalt.err (!%p245_p7)
}
  0x11   :  { %s300_s22 = smov 128   ;;  %s301_s23 = smov 8  }
  0x12   :  { %22 = dma.hbm_to_vmem [thread:$0]  %s380_s0, 256, %s17_s13, [#allocation3], %s300_s22, %s300_s22, %s301_s23  }
  0x13   :  { %s302_s26 = smov [#allocation5]   ;;  %s249_s30 = scalar_lea.hbm %s381_s1, 512 }
  0x14   :  { %s28_s27 = sshll.u32 %s302_s26, 4  ;;  %p250_p8 = scmp.ne.s32.totalorder %s381_s1, %s249_s30  ;;  %s29_s27 = int_to_ptr.vmem [resolvable:$true] %s28_s27 }
  0x15   :  { %p253_p9 = scmp.lt.u32.totalorder %s249_s30, %s381_s1 }
  0x17   :  { %p255_p10 = pnand %p253_p9, %p250_p8 }
  0x19   :  { %258 = shalt.err (!%p255_p10)
}
  0x1a   :  { %s259_s8 = scalar_lea.vmem %s29_s27, 512  ;;  %p264_p12 = scmp.lt.s32.totalorder %s29_s27, %s29_s27 }
  0x1b   :  { %p260_p11 = scmp.ne.s32.totalorder %s29_s27, %s259_s8  ;;  %p265_p13 = scmp.lt.s32.totalorder %s259_s8, %s259_s8 }
  0x1d   :  { %p266_p0 = por %p265_p13, %p264_p12 }
  0x1f   :  { %p267_p1 = pnand %p266_p0, %p260_p11 }
  0x21   :  { %270 = shalt.err (!%p267_p1)
}
  0x22   :  { %34 = dma.hbm_to_vmem [thread:$0]  %s381_s1, 512, %s29_s27, [#allocation6], %s300_s22, %s300_s22, %s301_s23  }
  0x23   :  { %293 = dma.done.wait [#allocation3], 256  }
  0x24   :  { %294 = vsyncadd [#allocation3], 4294967040 }
  0x25   :  { %295 = dma.done.wait [#allocation6], 512  }
  0x26   :  { %296 = vsyncadd [#allocation6], 4294966784  ;;  %vm45_vm0 = vcmask 261120   ;;  %v43_v0 = vld [vmem:[#allocation2] sm:$0xff]  ;;  %v44_v1 = vld [vmem:[#allocation2 + $0x8] sm:$0xff]  ;;  %s303_s11 = smov [#allocation7]  }
  0x27   :  { %v46_v2 = vsel %vm45_vm0, %v43_v0, 0.0  ;;  %v52_v3 = vmul.f32 %v43_v0, %v43_v0  ;;  %v53_v4 = vmul.f32 %v44_v1, %v44_v1  ;;  %v49_v6 = vsel %vm45_vm0, %v44_v1, 0.0  ;;  %v78_v8 = vld [vmem:[#allocation5] sm:$0xff]  ;;  %v79_v9 = vld [vmem:[#allocation5 + $0x8] sm:$0xff]  ;;  %v80_v10 = vld [vmem:[#allocation5 + $0x10] sm:$0xff]  ;;  %s177_s12 = sshll.u32 %s303_s11, 4  ;;  %s178_s12 = int_to_ptr.vmem [resolvable:$true] %s177_s12 }
  0x28   :  { %47 = vadd.xlane.f32.xlu0 %v46_v2  ;;  %v210_v11 = vpack.c.bf16 %v79_v9, %v78_v8  ;;  %v81_v12 = vld [vmem:[#allocation5 + $0x18] sm:$0xff]  ;;  %v190_v36 = vld [vmem:[%s382_s2] ss:$0 sm:$0xff]  ;;  %s271_s13 = scalar_lea.vmem %s178_s12, 256  ;;  %p276_p3 = scmp.lt.s32.totalorder %s178_s12, %s178_s12 }
  0x29   :  { %v54_v5 = vsel %vm45_vm0, %v52_v3, 0.0  ;;  %v57_v7 = vsel %vm45_vm0, %v53_v4, 0.0  ;;  %v214_v13 = vpack.c.bf16 %v81_v12, %v80_v10  ;;  %p272_p2 = scmp.ne.s32.totalorder %s178_s12, %s271_s13  ;;  %p277_p4 = scmp.lt.s32.totalorder %s271_s13, %s271_s13 }
  0x2a   :  { %55 = vadd.xlane.f32.xlu1 %v54_v5  ;;  %211 = vmatprep.subr.bf16.mxu0 %v210_v11 }
  0x2b   :  { %213 = vmatpush3.bf16.msra.mxu0 %v210_v11  ;;  %p278_p5 = por %p277_p4, %p276_p3 }
  0x2c   :  { %50 = vadd.xlane.f32.xlu0 %v49_v6  ;;  %215 = vmatprep.subr.bf16.mxu0 %v214_v13 }
  0x2d   :  { %p279_p6 = pnand %p278_p5, %p272_p2 }
  0x2e   :  { %58 = vadd.xlane.f32.xlu1 %v57_v7 }
  0x2f   :  { %217 = vmatpush3.bf16.msra.mxu0 %v214_v13 }
  0xb5   :  { %v48_v14 = vpop.xlane.xlu0 %47 }
  0xb6   :  { %v60_v15 = vmul.f32 0.03125, %v48_v14 }
  0xb7   :  { %v56_v16 = vpop.xlane.xlu1 %55 }
  0xb8   :  { %v64_v17 = vmul.f32 %v60_v15, %v60_v15  ;;  %v62_v18 = vmul.f32 0.03125, %v56_v16  ;;  %v74_v30 = vsub.f32 %v43_v0, %v60_v15 }
  0xb9   :  { %v51_v19 = vpop.xlane.xlu0 %50 }
  0xba   :  { %v66_v20 = vsub.f32 %v62_v18, %v64_v17  ;;  %v61_v21 = vmul.f32 0.03125, %v51_v19 }
  0xbb   :  { %v59_v22 = vpop.xlane.xlu1 %58 }
  0xbc   :  { %v68_v23 = vmax.f32 %v66_v20, 0.0  ;;  %v65_v24 = vmul.f32 %v61_v21, %v61_v21  ;;  %v63_v25 = vmul.f32 0.03125, %v59_v22  ;;  %v75_v33 = vsub.f32 %v44_v1, %v61_v21 }
  0xbe   :  { %v70_v26 = vadd.f32 1e-05, %v68_v23  ;;  %v67_v27 = vsub.f32 %v63_v25, %v65_v24 }
  0xc0   :  { %223 = vrsqrt.f32 %v70_v26  ;;  %v69_v28 = vmax.f32 %v67_v27, 0.0 }
  0xc2   :  { %v71_v29 = vadd.f32 1e-05, %v69_v28 }
  0xc4   :  { %225 = vrsqrt.f32 %v71_v29 }
  0xca   :  { %v224_v31 = vpop.eup %223 }
  0xcb   :  { %v76_v32 = vmul.f32 %v224_v31, %v74_v30 }
  0xcd   :  { %207 = vmatprep.mubr.msk.f32.mxu0 %vm45_vm0, %v76_v32 }
  0xce   :  { %v226_v34 = vpop.eup %225 }
  0xcf   :  { %v77_v35 = vmul.f32 %v226_v34, %v75_v33 }
  0xd1   :  { %208 = vmatmul.mubr.msk.f32.vlgmr.msra.gmra.mrb[0].mxu0 %vm45_vm0, %v77_v35 }
 0x1a4   :  { %v209_v37 = vpop.f32.mrb[0].mxu0 }
 0x1a5   :  { %v167_v38 = vadd.f32 %v209_v37, %v190_v36  ;;  %v161_v39 = vpop.f32.mrb[1].mxu0 }
 0x1a6   :  { %v162_v40 = vadd.f32 %v190_v36, %v161_v39 }
 0x1a7   :  { %171 = vst.msk [vmem:[#allocation7 + $0x8] sm:$0xff] %vm45_vm0, %v167_v38 }
 0x1a8   :  { %170 = vst.msk [vmem:[#allocation7] sm:$0xff] %vm45_vm0, %v162_v40 }
 0x1a9   :  { %282 = shalt.err (!%p279_p6)
}
 0x1aa   :  { %s283_s15 = scalar_lea.hbm %s383_s3, 256 }
 0x1ab   :  { %p284_p7 = scmp.ne.s32.totalorder %s383_s3, %s283_s15  ;;  %p287_p8 = scmp.lt.u32.totalorder %s283_s15, %s383_s3 }
 0x1ad   :  { %p289_p9 = pnand %p287_p8, %p284_p7 }
 0x1af   :  { %292 = shalt.err (!%p289_p9)
}
 0x1b0   :  { %183 = dma.vmem_to_hbm [thread:$0]  %s178_s12, 256, %s383_s3, [#allocation4], %s300_s22, %s300_s22, %s301_s23  }
 0x1b1   :  { %297 = dma.done.wait [#allocation4], 256  }
 0x1b2   :  { %298 = vsyncadd [#allocation4], 4294967040 }
 0x1b3   :  { %187 = vsyncpa [#allocation3], 1 }
 0x1b4   :  { %188 = vsyncpa [#allocation6], 1 }
 0x1b5   :  { %189 = vsyncpa [#allocation4], 1 }

</bundles_post_ra>
